<compile_context>
chip_gen: v7x
topology: tpu7x:2x2x1
jax: 0.10.0
libtpu: 0.0.40
codegen_flags: <defaults>
</compile_context>

<pallas_src>
import functools

import jax
import jax.numpy as jnp
from jax.experimental import pallas as pl
from jax.experimental.pallas import tpu as pltpu


def _round_up(x, m):
    return ((x + m - 1) // m) * m


def _vmem_limit_bytes():
    """~7/8 of physical VMEM: leaves headroom for Mosaic-internal scratch."""
    try:
        cap = int(pltpu.get_tpu_info().vmem_capacity_bytes)
    except Exception:
        cap = 64 * 1024 * 1024  # conservative (v7x-sized) fallback
    return max((cap * 7) // 8, 32 * 1024 * 1024)


def _linear_kernel_kacc(x_ref, w_ref, b_ref, o_ref, acc_ref):
    """One (tm, tn) output tile, accumulating over the K grid axis (axis 2)."""
    k = pl.program_id(2)

    @pl.when(k == 0)
    def _():
        acc_ref[...] = jnp.zeros_like(acc_ref)

    # Hot path: MXU matmul with f32 accumulation.
    acc_ref[...] += jnp.dot(
        x_ref[...], w_ref[...], preferred_element_type=jnp.float32
    )

    # Epilogue: bias add (broadcast over rows) + cast, exactly once per tile.
    @pl.when(k == pl.num_programs(2) - 1)
    def _():
        o_ref[...] = (
            acc_ref[...] + b_ref[...].astype(jnp.float32)
        ).astype(o_ref.dtype)


def _linear_kernel_fullk(x_ref, w_ref, b_ref, o_ref):
    """Whole K in one tile: no scratch accumulator, no per-step branches."""
    o_ref[...] = (
        jnp.dot(x_ref[...], w_ref[...], preferred_element_type=jnp.float32)
        + b_ref[...].astype(jnp.float32)
    ).astype(o_ref.dtype)


def prepare_linear_params(w, b, compute_dtype=jnp.bfloat16):
    """Transpose + pad the static Linear weight/bias ONCE, outside the hot path.

    w: (D_out, D_in) PyTorch-layout weight.  b: (D_out,).
    Returns (w_padded (Ka, Na) in compute dtype, bias row (1, Na) f32, D_out).
    """
    n_out, k_in = w.shape
    w_t = jnp.transpose(w).astype(compute_dtype)  # (K, N)
    ka = _round_up(k_in, 128)
    na = _round_up(n_out, 128)
    w_p = jnp.pad(w_t, ((0, ka - k_in), (0, na - n_out)))
    b_p = jnp.pad(b.astype(jnp.float32), (0, na - n_out)).reshape(1, na)
    return jax.block_until_ready(w_p), jax.block_until_ready(b_p), n_out


@functools.partial(
    jax.jit,
    static_argnames=("n_out", "tm", "tn", "tk", "compute_dtype", "out_dtype"),
)
def linear_pallas(x, w_p, b_p, *, n_out, tm=512, tn=512, tk=None,
                  compute_dtype=jnp.bfloat16, out_dtype=None):
    """y = x @ W^T + b via a tiled Pallas matmul.

    x:   (B, D_in)
    w_p: (Ka, Na)  pre-transposed + 128-aligned padded weight (see prepare_linear_params)
    b_p: (1, Na)   pre-padded f32 bias row
    """
    B, K = x.shape
    Ka, Na = w_p.shape
    assert Ka >= K and Ka % 128 == 0 and Na % 128 == 0
    if out_dtype is None:
        out_dtype = x.dtype

    x = x.astype(compute_dtype)
    w_p = w_p.astype(compute_dtype)  # no-op when pre-prepared in compute_dtype

    # Sublane packing: bf16 packs 16 rows per vreg, f32 packs 8.
    sub = 16 if jnp.dtype(compute_dtype).itemsize <= 2 else 8
    Ma = _round_up(B, sub)

    # Tile selection (all shapes static at trace time).
    if tk is None:
        tk = 2048 if jnp.dtype(compute_dtype).itemsize <= 2 else 1024
    tm = min(tm, Ma)
    tn = min(tn, Na)
    # Collapse the K grid axis when the whole (aligned) K fits in one tile.
    tk = Ka if Ka <= tk else tk

    # v7x has 2 TensorCores: if the batch gives only one parallel block, split N
    # into two 128-aligned blocks so both cores get work.
    if (Ma // tm) == 1 and (Na // tn) == 1 and Na % 256 == 0:
        tn = Na // 2

    Mp = _round_up(Ma, tm)
    Kp = _round_up(Ka, tk)
    Np = _round_up(Na, tn)

    # Zero padding is exact for matmul + bias; it is sliced off afterwards.
    # Only pad when actually unaligned (Python-level shape checks).
    if (Mp, Kp) != (B, K):
        x = jnp.pad(x, ((0, Mp - B), (0, Kp - K)))
    if (Kp, Np) != (Ka, Na):
        w_p = jnp.pad(w_p, ((0, Kp - Ka), (0, Np - Na)))
    if Np != Na:
        b_p = jnp.pad(b_p, ((0, 0), (0, Np - Na)))

    grid = (Mp // tm, Np // tn, Kp // tk)  # reduction (K) axis last
    n_k = grid[2]

    itemsize = jnp.dtype(compute_dtype).itemsize
    cost = pl.CostEstimate(
        flops=2 * Mp * Np * Kp,
        transcendentals=0,
        bytes_accessed=(Mp * Kp * itemsize
                        + Kp * Np * itemsize
                        + Mp * Np * jnp.dtype(out_dtype).itemsize),
    )

    common = dict(
        out_shape=jax.ShapeDtypeStruct((Mp, Np), out_dtype),
        grid=grid,
        in_specs=[
            # x tile depends on (i, k) only.
            pl.BlockSpec((tm, tk), lambda i, j, k: (i, k)),
            # Weight tile ignores the M index (weight-stationary across M).
            pl.BlockSpec((tk, tn), lambda i, j, k: (k, j)),
            # Bias tile: one lane-dense row per N tile.
            pl.BlockSpec((1, tn), lambda i, j, k: (0, j)),
        ],
        out_specs=pl.BlockSpec((tm, tn), lambda i, j, k: (i, j)),
        compiler_params=pltpu.CompilerParams(
            dimension_semantics=("parallel", "parallel", "arbitrary"),
            vmem_limit_bytes=_vmem_limit_bytes(),
        ),
        cost_estimate=cost,
    )

    if n_k == 1:
        out_padded = pl.pallas_call(_linear_kernel_fullk, **common)(x, w_p, b_p)
    else:
        out_padded = pl.pallas_call(
            _linear_kernel_kacc,
            scratch_shapes=[pltpu.VMEM((tm, tn), jnp.float32)],
            **common,
        )(x, w_p, b_p)

    return out_padded[:B, :n_out]


def init_params(key, input_dim, output_dim, dtype=jnp.float32):
    # Mimics torch.nn.Linear init: U(-1/sqrt(fan_in), 1/sqrt(fan_in)).
    kw, kb = jax.random.split(key)
    bound = 1.0 / jnp.sqrt(jnp.array(input_dim, dtype=jnp.float32))
    w = jax.random.uniform(kw, (output_dim, input_dim), dtype, -bound, bound)
    b = jax.random.uniform(kb, (output_dim,), dtype, -bound, bound)
    return w, b


if __name__ == "__main__":
    key = jax.random.PRNGKey(0)
    k_x, k_p = jax.random.split(key)

    # Shapes consistent with the module's forward: y = x @ W^T + b.
    # (hidden_1 / hidden_2 / weight_decay are unused by the PyTorch module.)
    batch, input_dim, hidden_1, hidden_2, output_dim = 8, 16, 32, 32, 4

    x = jax.random.normal(k_x, (batch, input_dim), jnp.float32)
    w, b = init_params(k_p, input_dim, output_dim)

    ref = x @ w.T + b[None, :]

    # Default fast path: bf16 MXU compute with f32 accumulation.
    w_bf16, b_row, n_out = prepare_linear_params(w, b, compute_dtype=jnp.bfloat16)
    out = linear_pallas(x, w_bf16, b_row, n_out=n_out)
    jax.block_until_ready(out)
    assert out.shape == (batch, output_dim)
    assert out.dtype == x.dtype
    assert jnp.allclose(out, ref, atol=2e-2, rtol=2e-2)

    # Opt-in exact f32 path (matches the PyTorch module bit-for-bit-ish).
    w_f32, b_row32, _ = prepare_linear_params(w, b, compute_dtype=jnp.float32)
    out_f32 = linear_pallas(
        x, w_f32, b_row32, n_out=n_out, compute_dtype=jnp.float32
    )
    jax.block_until_ready(out_f32)
    assert jnp.allclose(out_f32, ref, atol=1e-5, rtol=1e-5)

    print("KERNEL_OK")
</pallas_src>

<mosaic_0001>
module attributes {stable_mosaic.version = 11 : i64} {
  func.func @_linear_kernel_fullk(%arg0: i32, %arg1: i32, %arg2: i32, %arg3: memref<16x128xbf16, #tpu.memory_space<vmem>>, %arg4: memref<128x128xbf16, #tpu.memory_space<vmem>>, %arg5: memref<1x128xf32, #tpu.memory_space<vmem>>, %arg6: memref<16x128xf32, #tpu.memory_space<vmem>>) attributes {dimension_semantics = [#tpu.dimension_semantics<parallel>, #tpu.dimension_semantics<parallel>, #tpu.dimension_semantics<arbitrary>], iteration_bounds = array<i64: 1, 1, 1>, scalar_prefetch = 0 : i64, scratch_operands = 0 : i64, tpu.core_type = #tpu.core_type<tc>, window_params = [{transform_indices = @transform_0, window_bounds = array<i64: 16, 128>}, {transform_indices = @transform_1, window_bounds = array<i64: 128, 128>}, {transform_indices = @transform_2, window_bounds = array<i64: 1, 128>}, {transform_indices = @transform_3, window_bounds = array<i64: 16, 128>}]} {
    %c0 = arith.constant 0 : index
    %c0_0 = arith.constant 0 : index
    %0 = vector.load %arg3[%c0, %c0_0] : memref<16x128xbf16, #tpu.memory_space<vmem>>, vector<16x128xbf16>
    %c0_1 = arith.constant 0 : index
    %c0_2 = arith.constant 0 : index
    %1 = vector.load %arg4[%c0_1, %c0_2] : memref<128x128xbf16, #tpu.memory_space<vmem>>, vector<128x128xbf16>
    %cst = arith.constant dense<0.000000e+00> : vector<16x128xf32>
    %2 = tpu.matmul %0, %1, %cst {dimension_numbers = #tpu.dot_dimension_numbers<[1], [0], [0], [1], [0, 0, 1, 1], [], []>} : vector<16x128xbf16>, vector<128x128xbf16>, vector<16x128xf32> -> vector<16x128xf32>
    %c0_3 = arith.constant 0 : index
    %c0_4 = arith.constant 0 : index
    %3 = vector.load %arg5[%c0_3, %c0_4] : memref<1x128xf32, #tpu.memory_space<vmem>>, vector<1x128xf32>
    %4 = vector.broadcast %3 : vector<1x128xf32> to vector<16x128xf32>
    %5 = arith.addf %2, %4 : vector<16x128xf32>
    %c0_5 = arith.constant 0 : index
    %c0_6 = arith.constant 0 : index
    %6 = vector.load %arg6[%c0_5, %c0_6] : memref<16x128xf32, #tpu.memory_space<vmem>>, vector<16x128xf32>
    tpu.vector_store %arg6[%c0_5, %c0_6], %5 {strides = array<i32>} : memref<16x128xf32, #tpu.memory_space<vmem>>, vector<16x128xf32>,
    return
  }
  func.func @transform_0(%arg0: i32, %arg1: i32, %arg2: i32) -> (i32, i32) {
    %c0_i32 = arith.constant 0 : i32
    return %arg0, %arg2 : i32, i32
  }
  func.func @transform_1(%arg0: i32, %arg1: i32, %arg2: i32) -> (i32, i32) {
    %c0_i32 = arith.constant 0 : i32
    return %arg2, %arg1 : i32, i32
  }
  func.func @transform_2(%arg0: i32, %arg1: i32, %arg2: i32) -> (i32, i32) {
    %c0_i32 = arith.constant 0 : i32
    %c0_i32_0 = arith.constant 0 : i32
    return %c0_i32, %arg1 : i32, i32
  }
  func.func @transform_3(%arg0: i32, %arg1: i32, %arg2: i32) -> (i32, i32) {
    %c0_i32 = arith.constant 0 : i32
    return %arg0, %arg1 : i32, i32
  }
}

</mosaic_0001>

<bundles_post_ra>
// kernel: linear_pallas.1
= control target key start
LH: loop header
LB: loop body
LE: loop exit
PB: predicated region body
PF: predicated region fallthrough
CT: control target
= control target key end

     0   :  { %8 = vsyncpa [#allocation3], 0  ;;  %s233_s12 = smov [#allocation2]   ;;  %s282_s0 = inlined_call_operand.vmem [shape: bf16[16,128], index: 0, kind: input, shape index: {}]   ;;  %s283_s1 = inlined_call_operand.hbm [shape: bf16[128,128], index: 1, kind: input, shape index: {}]   ;;  %s284_s2 = inlined_call_operand.vmem [shape: f32[1,128], index: 2, kind: input, shape index: {}]   ;;  %s285_s3 = inlined_call_operand.vmem [shape: f32[16,128], index: 3, kind: output, shape index: {}]  }
   0x1   :  { %s16_s13 = sshll.u32 %s233_s12, 4  ;;  %s209_s16 = scalar_lea.hbm %s283_s1, 1024  ;;  %s17_s13 = int_to_ptr.vmem [resolvable:$true] %s16_s13 }
   0x2   :  { %p210_p0 = scmp.ne.s32.totalorder %s283_s1, %s209_s16  ;;  %p213_p1 = scmp.lt.u32.totalorder %s209_s16, %s283_s1 }
   0x4   :  { %p215_p2 = pnand %p213_p1, %p210_p0 }
   0x6   :  { %218 = shalt.err (!%p215_p2)
}
   0x7   :  { %s219_s21 = scalar_lea.vmem %s17_s13, 1024  ;;  %p224_p4 = scmp.lt.s32.totalorder %s17_s13, %s17_s13 }
   0x8   :  { %p220_p3 = scmp.ne.s32.totalorder %s17_s13, %s219_s21  ;;  %p225_p5 = scmp.lt.s32.totalorder %s219_s21, %s219_s21 }
   0xa   :  { %p226_p6 = por %p225_p5, %p224_p4 }
   0xc   :  { %p227_p7 = pnand %p226_p6, %p220_p3 }
   0xe   :  { %230 = shalt.err (!%p227_p7)
}
   0xf   :  { %s234_s22 = smov 64   ;;  %s235_s23 = smov 4  }
  0x10   :  { %22 = dma.hbm_to_vmem [thread:$0]  %s283_s1, 1024, %s17_s13, [#allocation3], %s234_s22, %s234_s22, %s235_s23  }
  0x11   :  { %231 = dma.done.wait [#allocation3], 1024  }
  0x12   :  { %232 = vsyncadd [#allocation3], 4294966272  ;;  %v236_v0 = vmov 0.0   ;;  %vm237_vm0 = vmmov 0   ;;  %v200_v1 = vld [vmem:[#allocation2] sm:$0xff]   ;;  %v201_v2 = vld [vmem:[#allocation2 + $0x8] sm:$0xff]  }
  0x13   :  { %175 = vmatprep.subr.bf16.mxu0 %v236_v0  ;;  %191 = vmatprep.mubr.msk.bf16.mxu0 %vm237_vm0, %v236_v0  ;;  %v202_v3 = vld [vmem:[#allocation2 + $0x10] sm:$0xff]   ;;  %v203_v4 = vld [vmem:[#allocation2 + $0x18] sm:$0xff]   ;;  %v204_v5 = vld [vmem:[#allocation2 + $0x20] sm:$0xff]  }
  0x14   :  { %176 = vmatpush3.bf16.msra.mxu0 %v200_v1  ;;  %v205_v6 = vld [vmem:[#allocation2 + $0x28] sm:$0xff]   ;;  %v206_v7 = vld [vmem:[#allocation2 + $0x30] sm:$0xff]   ;;  %v207_v8 = vld [vmem:[#allocation2 + $0x38] sm:$0xff]  }
  0x15   :  { %177 = vmatprep.subr.bf16.mxu0 %v236_v0  ;;  %v208_v9 = vld [vmem:[%s282_s0] sm:$0xff]  }
  0x16   :  { %v156_v10 = vld [vmem:[%s284_s2] ss:$0 sm:$0xff] }
  0x18   :  { %178 = vmatpush3.bf16.msra.mxu0 %v201_v2 }
  0x19   :  { %179 = vmatprep.subr.bf16.mxu0 %v236_v0 }
  0x1c   :  { %180 = vmatpush3.bf16.msra.mxu0 %v202_v3 }
  0x1d   :  { %181 = vmatprep.subr.bf16.mxu0 %v236_v0 }
  0x20   :  { %182 = vmatpush3.bf16.msra.mxu0 %v203_v4 }
  0x21   :  { %183 = vmatprep.subr.bf16.mxu0 %v236_v0 }
  0x24   :  { %184 = vmatpush3.bf16.msra.mxu0 %v204_v5 }
  0x25   :  { %185 = vmatprep.subr.bf16.mxu0 %v236_v0 }
  0x28   :  { %186 = vmatpush3.bf16.msra.mxu0 %v205_v6 }
  0x29   :  { %187 = vmatprep.subr.bf16.mxu0 %v236_v0 }
  0x2c   :  { %188 = vmatpush3.bf16.msra.mxu0 %v206_v7 }
  0x2d   :  { %189 = vmatprep.subr.bf16.mxu0 %v236_v0 }
  0x30   :  { %190 = vmatpush3.bf16.msra.mxu0 %v207_v8 }
  0x33   :  { %192 = vmatmul.mubr.bf16.vlgmr.msra.gmra.mrb[0].mxu0 %v208_v9 }
 0x106   :  { %v142_v11 = vpop.f32.mrb[0].mxu0 }
 0x107   :  { %v143_v12 = vadd.f32 %v156_v10, %v142_v11  ;;  %v193_v13 = vpop.f32.mrb[1].mxu0 }
 0x108   :  { %v145_v14 = vpop.f32.mrb[2].mxu0 }
 0x109   :  { %149 = vst [vmem:[%s285_s3] sm:$0xff] %v143_v12  ;;  %v146_v15 = vadd.f32 %v156_v10, %v145_v14  ;;  %v194_v16 = vpop.f32.mrb[3].mxu0 }
 0x10b   :  { %150 = vst [vmem:[%s285_s3 + $0x8] sm:$0xff] %v146_v15 }
 0x10c   :  { %155 = vsyncpa [#allocation3], 1 }

</bundles_post_ra>
